<compile_context>
chip_gen: v7x
topology: tpu7x:2x2x1
jax: 0.10.0
libtpu: 0.0.40
codegen_flags: <defaults>
</compile_context>

<pallas_src>
import math
import functools

import jax
import jax.numpy as jnp
from jax.experimental import pallas as pl
from jax.experimental.pallas import tpu as pltpu

# ----- model hyper-parameters (small, consistent with the module) -----------
B = 2          # batch
T = 8          # sequence length
N_HEAD = 4     # n_head
N_FEAT = 32    # n_feat
D_K = N_FEAT // N_HEAD
DROPOUT_RATE = 0.0   # eval-mode dropout == identity


def _mha_kernel(x_ref, wqkv_ref, bqkv_ref, wo_ref, bo_ref, o_ref, *, batch, seq):
    bt = batch * seq

    # ---- fused QKV projection: one lane-dense bf16 MXU matmul --------------
    # wqkv_ref: (F, 3*H*d_k), columns ordered [q_h0..q_h{H-1}, k_h0.., v_h0..];
    # the 1/sqrt(d_k) scale is pre-folded into the q columns / bias.
    proj = jnp.dot(x_ref[...], wqkv_ref[...],
                   preferred_element_type=jnp.float32)         # (B*T, 3*H*d_k) f32
    proj = proj + bqkv_ref[...]

    # ---- head split onto the leading axis (small relayout copies) ----------
    grouped = jnp.stack(
        [proj[:, g * D_K:(g + 1) * D_K] for g in range(3 * N_HEAD)],
        axis=0)                                                # (3H, B*T, d_k)
    q = grouped[0:N_HEAD].reshape(N_HEAD * batch, seq, D_K)    # (H*B, T, d_k)
    k = grouped[N_HEAD:2 * N_HEAD].reshape(N_HEAD * batch, seq, D_K)
    v = grouped[2 * N_HEAD:].reshape(N_HEAD * batch, seq, D_K)

    # ---- scaled dot-product attention (scale pre-folded; f32 softmax) ------
    scores = jnp.einsum("gqd,gkd->gqk", q, k,
                        preferred_element_type=jnp.float32)    # (H*B, T, T)
    m = jnp.max(scores, axis=-1, keepdims=True)
    p = jnp.exp(scores - m)
    inv = pl.reciprocal(jnp.sum(p, axis=-1, keepdims=True), approx=True)
    attn = p * inv
    # dropout with p=DROPOUT_RATE in eval mode is the identity
    ctx = jnp.einsum("gqk,gkd->gqd", attn, v,
                     preferred_element_type=jnp.float32)       # (H*B, T, d_k)

    # ---- regroup heads onto the lane axis; single output-proj matmul -------
    ctx = ctx.reshape(N_HEAD, bt, D_K)                         # leading-dim reshape
    ctx2d = jnp.concatenate([ctx[h] for h in range(N_HEAD)], axis=1)   # (B*T, H*d_k)
    out = jnp.dot(ctx2d.astype(wo_ref.dtype), wo_ref[...],
                  preferred_element_type=jnp.float32) + bo_ref[...]
    o_ref[...] = out.astype(o_ref.dtype)                       # one (B*T, F) store


def prepare_params(params):
    """Host-side re-layout / dtype cast of nn.Linear params for the fused kernel."""
    scale = 1.0 / math.sqrt(D_K)
    # Weights are stored transposed (in_features, out_features); y = x @ w + b.
    w_qkv = jnp.concatenate(
        [params["wq"] * scale, params["wk"], params["wv"]], axis=1)   # (F, 3F)
    b_qkv = jnp.concatenate(
        [params["bq"] * scale, params["bk"], params["bv"]], axis=1)   # (1, 3F)
    return {
        "w_qkv": w_qkv.astype(jnp.bfloat16),   # bf16 MXU operand
        "b_qkv": b_qkv.astype(jnp.float32),    # bias added in f32
        "wo": params["wo"].astype(jnp.bfloat16),
        "bo": params["bo"].astype(jnp.float32),
    }


def multi_headed_attention(x, prepared):
    """x: (B, T, F) float32. prepared: output of prepare_params."""
    Bn, Tn, Fn = x.shape
    assert Fn == N_FEAT
    bt = Bn * Tn
    x2d = x.reshape(bt, Fn).astype(jnp.bfloat16)   # bf16 MXU operand

    w_qkv, b_qkv = prepared["w_qkv"], prepared["b_qkv"]
    wo, bo = prepared["wo"], prepared["bo"]

    vmem = lambda: pl.BlockSpec(memory_space=pltpu.MemorySpace.VMEM)

    flops = (2 * bt * Fn * 3 * Fn                        # fused QKV projection
             + 2 * 2 * (N_HEAD * Bn) * Tn * Tn * D_K     # scores + attn @ v
             + 2 * bt * Fn * Fn)                         # output projection
    transcendentals = (N_HEAD * Bn) * Tn * Tn + (N_HEAD * Bn) * Tn
    operands = (x2d, w_qkv, b_qkv, wo, bo)
    bytes_accessed = (sum(a.size * a.dtype.itemsize for a in operands)
                      + bt * Fn * 4)                     # f32 output

    out2d = pl.pallas_call(
        functools.partial(_mha_kernel, batch=Bn, seq=Tn),
        out_shape=jax.ShapeDtypeStruct((bt, Fn), jnp.float32),
        in_specs=[vmem() for _ in range(5)],
        out_specs=vmem(),
        cost_estimate=pl.CostEstimate(flops=flops,
                                      transcendentals=transcendentals,
                                      bytes_accessed=bytes_accessed),
    )(*operands)

    return out2d.reshape(Bn, Tn, Fn)


def _init_params(key):
    """Deterministic init mimicking nn.Linear defaults (uniform +-1/sqrt(fan_in)).
    Weights are stored transposed: shape (in_features, out_features)."""
    bound = 1.0 / math.sqrt(N_FEAT)
    keys = jax.random.split(key, 8)

    def u(k, shape):
        return jax.random.uniform(k, shape, jnp.float32, -bound, bound)

    return {
        "wq": u(keys[0], (N_FEAT, N_FEAT)), "bq": u(keys[1], (1, N_FEAT)),
        "wk": u(keys[2], (N_FEAT, N_FEAT)), "bk": u(keys[3], (1, N_FEAT)),
        "wv": u(keys[4], (N_FEAT, N_FEAT)), "bv": u(keys[5], (1, N_FEAT)),
        "wo": u(keys[6], (N_FEAT, N_FEAT)), "bo": u(keys[7], (1, N_FEAT)),
    }


def _reference(x, params):
    """Pure-JAX f32 reference matching the PyTorch forward (mask=None, eval)."""
    Bn = x.shape[0]
    q = (x @ params["wq"] + params["bq"]).reshape(Bn, -1, N_HEAD, D_K)
    k = (x @ params["wk"] + params["bk"]).reshape(Bn, -1, N_HEAD, D_K)
    v = (x @ params["wv"] + params["bv"]).reshape(Bn, -1, N_HEAD, D_K)
    q = q.transpose(0, 2, 1, 3)     # (B, H, T, d_k)
    k = k.transpose(0, 2, 1, 3)
    v = v.transpose(0, 2, 1, 3)
    scores = jnp.einsum("bhqd,bhkd->bhqk", q, k) / math.sqrt(D_K)
    attn = jax.nn.softmax(scores, axis=-1)
    ctx = jnp.einsum("bhqk,bhkd->bhqd", attn, v)
    ctx = ctx.transpose(0, 2, 1, 3).reshape(Bn, -1, N_HEAD * D_K)
    return ctx @ params["wo"] + params["bo"]


if __name__ == "__main__":
    key = jax.random.PRNGKey(0)
    kx, kp = jax.random.split(key)
    x = jax.random.normal(kx, (B, T, N_FEAT), jnp.float32)
    params = _init_params(kp)
    prepared = prepare_params(params)

    out = multi_headed_attention(x, prepared)
    out = jax.block_until_ready(out)

    ref = _reference(x, params)
    assert out.shape == (B, T, N_FEAT)
    # tolerance accounts for bf16 MXU operands (f32 accumulate) and the EUP
    # approximate reciprocal in the softmax denominator
    assert jnp.allclose(out, ref, atol=2e-2, rtol=2e-2), "mismatch vs reference"

    print("KERNEL_OK")
</pallas_src>

<mosaic_0001>
module attributes {stable_mosaic.version = 11 : i64} {
  func.func @_mha_kernel(%arg0: memref<16x32xbf16, #tpu.memory_space<vmem>>, %arg1: memref<32x96xbf16, #tpu.memory_space<vmem>>, %arg2: memref<1x96xf32, #tpu.memory_space<vmem>>, %arg3: memref<32x32xbf16, #tpu.memory_space<vmem>>, %arg4: memref<1x32xf32, #tpu.memory_space<vmem>>, %arg5: memref<16x32xf32, #tpu.memory_space<vmem>>) attributes {dimension_semantics = [], scalar_prefetch = 0 : i64, scratch_operands = 0 : i64, tpu.core_type = #tpu.core_type<tc>} {
    %c0 = arith.constant 0 : index
    %c0_0 = arith.constant 0 : index
    %0 = vector.load %arg0[%c0, %c0_0] : memref<16x32xbf16, #tpu.memory_space<vmem>>, vector<16x32xbf16>
    %c0_1 = arith.constant 0 : index
    %c0_2 = arith.constant 0 : index
    %1 = vector.load %arg1[%c0_1, %c0_2] : memref<32x96xbf16, #tpu.memory_space<vmem>>, vector<32x96xbf16>
    %cst = arith.constant dense<0.000000e+00> : vector<16x96xf32>
    %2 = tpu.matmul %0, %1, %cst {dimension_numbers = #tpu.dot_dimension_numbers<[1], [0], [0], [1], [0, 0, 1, 1], [], []>} : vector<16x32xbf16>, vector<32x96xbf16>, vector<16x96xf32> -> vector<16x96xf32>
    %c0_3 = arith.constant 0 : index
    %c0_4 = arith.constant 0 : index
    %3 = vector.load %arg2[%c0_3, %c0_4] : memref<1x96xf32, #tpu.memory_space<vmem>>, vector<1x96xf32>
    %4 = vector.broadcast %3 : vector<1x96xf32> to vector<16x96xf32>
    %5 = arith.addf %2, %4 : vector<16x96xf32>
    %6 = vector.extract_strided_slice %5 {offsets = [0, 0], sizes = [16, 8], strides = [1, 1]} : vector<16x96xf32> to vector<16x8xf32>
    %7 = vector.extract_strided_slice %5 {offsets = [0, 8], sizes = [16, 8], strides = [1, 1]} : vector<16x96xf32> to vector<16x8xf32>
    %8 = vector.extract_strided_slice %5 {offsets = [0, 16], sizes = [16, 8], strides = [1, 1]} : vector<16x96xf32> to vector<16x8xf32>
    %9 = vector.extract_strided_slice %5 {offsets = [0, 24], sizes = [16, 8], strides = [1, 1]} : vector<16x96xf32> to vector<16x8xf32>
    %10 = vector.extract_strided_slice %5 {offsets = [0, 32], sizes = [16, 8], strides = [1, 1]} : vector<16x96xf32> to vector<16x8xf32>
    %11 = vector.extract_strided_slice %5 {offsets = [0, 40], sizes = [16, 8], strides = [1, 1]} : vector<16x96xf32> to vector<16x8xf32>
    %12 = vector.extract_strided_slice %5 {offsets = [0, 48], sizes = [16, 8], strides = [1, 1]} : vector<16x96xf32> to vector<16x8xf32>
    %13 = vector.extract_strided_slice %5 {offsets = [0, 56], sizes = [16, 8], strides = [1, 1]} : vector<16x96xf32> to vector<16x8xf32>
    %14 = vector.extract_strided_slice %5 {offsets = [0, 64], sizes = [16, 8], strides = [1, 1]} : vector<16x96xf32> to vector<16x8xf32>
    %15 = vector.extract_strided_slice %5 {offsets = [0, 72], sizes = [16, 8], strides = [1, 1]} : vector<16x96xf32> to vector<16x8xf32>
    %16 = vector.extract_strided_slice %5 {offsets = [0, 80], sizes = [16, 8], strides = [1, 1]} : vector<16x96xf32> to vector<16x8xf32>
    %17 = vector.extract_strided_slice %5 {offsets = [0, 88], sizes = [16, 8], strides = [1, 1]} : vector<16x96xf32> to vector<16x8xf32>
    %18 = vector.shape_cast %6 : vector<16x8xf32> to vector<1x16x8xf32>
    %19 = vector.shape_cast %7 : vector<16x8xf32> to vector<1x16x8xf32>
    %20 = vector.shape_cast %8 : vector<16x8xf32> to vector<1x16x8xf32>
    %21 = vector.shape_cast %9 : vector<16x8xf32> to vector<1x16x8xf32>
    %22 = vector.shape_cast %10 : vector<16x8xf32> to vector<1x16x8xf32>
    %23 = vector.shape_cast %11 : vector<16x8xf32> to vector<1x16x8xf32>
    %24 = vector.shape_cast %12 : vector<16x8xf32> to vector<1x16x8xf32>
    %25 = vector.shape_cast %13 : vector<16x8xf32> to vector<1x16x8xf32>
    %26 = vector.shape_cast %14 : vector<16x8xf32> to vector<1x16x8xf32>
    %27 = vector.shape_cast %15 : vector<16x8xf32> to vector<1x16x8xf32>
    %28 = vector.shape_cast %16 : vector<16x8xf32> to vector<1x16x8xf32>
    %29 = vector.shape_cast %17 : vector<16x8xf32> to vector<1x16x8xf32>
    %30 = tpu.concatenate %18, %19, %20, %21, %22, %23, %24, %25, %26, %27, %28, %29 in 0 : vector<1x16x8xf32>, vector<1x16x8xf32>, vector<1x16x8xf32>, vector<1x16x8xf32>, vector<1x16x8xf32>, vector<1x16x8xf32>, vector<1x16x8xf32>, vector<1x16x8xf32>, vector<1x16x8xf32>, vector<1x16x8xf32>, vector<1x16x8xf32>, vector<1x16x8xf32> -> vector<12x16x8xf32>
    %31 = vector.extract_strided_slice %30 {offsets = [0, 0, 0], sizes = [4, 16, 8], strides = [1, 1, 1]} : vector<12x16x8xf32> to vector<4x16x8xf32>
    %32 = vector.shape_cast %31 : vector<4x16x8xf32> to vector<8x8x8xf32>
    %33 = vector.extract_strided_slice %30 {offsets = [4, 0, 0], sizes = [4, 16, 8], strides = [1, 1, 1]} : vector<12x16x8xf32> to vector<4x16x8xf32>
    %34 = vector.shape_cast %33 : vector<4x16x8xf32> to vector<8x8x8xf32>
    %35 = vector.extract_strided_slice %30 {offsets = [8, 0, 0], sizes = [4, 16, 8], strides = [1, 1, 1]} : vector<12x16x8xf32> to vector<4x16x8xf32>
    %36 = vector.shape_cast %35 : vector<4x16x8xf32> to vector<8x8x8xf32>
    "tpu.trace_start"() <{level = 10 : i32, message = "gqd,gkd->gqk"}> : () -> ()
    %cst_5 = arith.constant dense<0.000000e+00> : vector<8x8x8xf32>
    %37 = tpu.matmul %32, %34, %cst_5 {dimension_numbers = #tpu.dot_dimension_numbers<[2], [2], [1], [1], [0, 0, 0, 1, 1, 1], [0], [0]>} : vector<8x8x8xf32>, vector<8x8x8xf32>, vector<8x8x8xf32> -> vector<8x8x8xf32>
    "tpu.trace_stop"() : () -> ()
    %cst_6 = arith.constant dense<0xFF800000> : vector<8x8xf32>
    %38 = vector.multi_reduction <maximumf>, %37, %cst_6 [2] : vector<8x8x8xf32> to vector<8x8xf32>
    %39 = vector.shape_cast %38 : vector<8x8xf32> to vector<8x8x1xf32>
    %40 = vector.broadcast %39 : vector<8x8x1xf32> to vector<8x8x8xf32>
    %41 = arith.subf %37, %40 : vector<8x8x8xf32>
    %42 = math.exp %41 : vector<8x8x8xf32>
    %cst_7 = arith.constant dense<0.000000e+00> : vector<8x8xf32>
    %43 = vector.multi_reduction <add>, %42, %cst_7 [2] : vector<8x8x8xf32> to vector<8x8xf32>
    %44 = vector.shape_cast %43 : vector<8x8xf32> to vector<8x8x1xf32>
    %45 = tpu.reciprocal %44 {approx = true} : vector<8x8x1xf32> -> vector<8x8x1xf32>
    %46 = vector.broadcast %45 : vector<8x8x1xf32> to vector<8x8x8xf32>
    %47 = arith.mulf %42, %46 : vector<8x8x8xf32>
    "tpu.trace_start"() <{level = 10 : i32, message = "gqk,gkd->gqd"}> : () -> ()
    %cst_8 = arith.constant dense<0.000000e+00> : vector<8x8x8xf32>
    %48 = tpu.matmul %47, %36, %cst_8 {dimension_numbers = #tpu.dot_dimension_numbers<[2], [1], [1], [2], [0, 0, 0, 1, 1, 2], [0], [0]>} : vector<8x8x8xf32>, vector<8x8x8xf32>, vector<8x8x8xf32> -> vector<8x8x8xf32>
    "tpu.trace_stop"() : () -> ()
    %49 = vector.shape_cast %48 : vector<8x8x8xf32> to vector<4x16x8xf32>
    %50 = vector.extract_strided_slice %49 {offsets = [0, 0, 0], sizes = [1, 16, 8], strides = [1, 1, 1]} : vector<4x16x8xf32> to vector<1x16x8xf32>
    %51 = vector.shape_cast %50 : vector<1x16x8xf32> to vector<16x8xf32>
    %52 = vector.extract_strided_slice %49 {offsets = [1, 0, 0], sizes = [1, 16, 8], strides = [1, 1, 1]} : vector<4x16x8xf32> to vector<1x16x8xf32>
    %53 = vector.shape_cast %52 : vector<1x16x8xf32> to vector<16x8xf32>
    %54 = vector.extract_strided_slice %49 {offsets = [2, 0, 0], sizes = [1, 16, 8], strides = [1, 1, 1]} : vector<4x16x8xf32> to vector<1x16x8xf32>
    %55 = vector.shape_cast %54 : vector<1x16x8xf32> to vector<16x8xf32>
    %56 = vector.extract_strided_slice %49 {offsets = [3, 0, 0], sizes = [1, 16, 8], strides = [1, 1, 1]} : vector<4x16x8xf32> to vector<1x16x8xf32>
    %57 = vector.shape_cast %56 : vector<1x16x8xf32> to vector<16x8xf32>
    %58 = tpu.concatenate %51, %53, %55, %57 in 1 : vector<16x8xf32>, vector<16x8xf32>, vector<16x8xf32>, vector<16x8xf32> -> vector<16x32xf32>
    %59 = arith.truncf %58 : vector<16x32xf32> to vector<16x32xbf16>
    %c0_9 = arith.constant 0 : index
    %c0_10 = arith.constant 0 : index
    %60 = vector.load %arg3[%c0_9, %c0_10] : memref<32x32xbf16, #tpu.memory_space<vmem>>, vector<32x32xbf16>
    %cst_11 = arith.constant dense<0.000000e+00> : vector<16x32xf32>
    %61 = tpu.matmul %59, %60, %cst_11 {dimension_numbers = #tpu.dot_dimension_numbers<[1], [0], [0], [1], [0, 0, 1, 1], [], []>} : vector<16x32xbf16>, vector<32x32xbf16>, vector<16x32xf32> -> vector<16x32xf32>
    %c0_12 = arith.constant 0 : index
    %c0_13 = arith.constant 0 : index
    %62 = vector.load %arg4[%c0_12, %c0_13] : memref<1x32xf32, #tpu.memory_space<vmem>>, vector<1x32xf32>
    %63 = vector.broadcast %62 : vector<1x32xf32> to vector<16x32xf32>
    %64 = arith.addf %61, %63 : vector<16x32xf32>
    %c0_14 = arith.constant 0 : index
    %c0_15 = arith.constant 0 : index
    %65 = vector.load %arg5[%c0_14, %c0_15] : memref<16x32xf32, #tpu.memory_space<vmem>>, vector<16x32xf32>
    tpu.vector_store %arg5[%c0_14, %c0_15], %64 {strides = array<i32>} : memref<16x32xf32, #tpu.memory_space<vmem>>, vector<16x32xf32>,
    return
  }
}

</mosaic_0001>

<bundles_post_ra>
// kernel: tpu_custom_call.1
= control target key start
LH: loop header
LB: loop body
LE: loop exit
PB: predicated region body
PF: predicated region fallthrough
CT: control target
= control target key end

     0   :  { %10 = vsyncpa [#allocation3], 0  ;;  %s2180_s0 = inlined_call_operand.hbm [shape: bf16[16,32], index: 0, kind: input, shape index: {}]   ;;  %s2181_s1 = inlined_call_operand.hbm [shape: bf16[32,96], index: 1, kind: input, shape index: {}]   ;;  %s2182_s2 = inlined_call_operand.vmem [shape: f32[1,96], index: 2, kind: input, shape index: {}]   ;;  %s2183_s3 = inlined_call_operand.hbm [shape: bf16[32,32], index: 3, kind: input, shape index: {}]   ;;  %s2184_s4 = inlined_call_operand.vmem [shape: f32[1,32], index: 4, kind: input, shape index: {}]   ;;  %s2185_s5 = inlined_call_operand.hbm [shape: f32[16,32], index: 5, kind: output, shape index: {}]  }
   0x1   :  { %11 = vsyncpa [#allocation6], 0 }
   0x2   :  { %12 = vsyncpa [#allocation4], 0  ;;  %s1912_s18 = smov [#allocation5]   ;;  %s1913_s20 = smov [#allocation2]  }
   0x3   :  { %s30_s19 = sshll.u32 %s1912_s18, 4  ;;  %s18_s21 = sshll.u32 %s1913_s20, 4  ;;  %s31_s19 = int_to_ptr.vmem [resolvable:$true] %s30_s19  ;;  %s1964_s21 = int_to_ptr.vmem [resolvable:$true] %s18_s21 }
   0x4   :  { %s1818_s24 = scalar_lea.hbm %s2181_s1, 256 }
   0x5   :  { %p1819_p0 = scmp.ne.s32.totalorder %s2181_s1, %s1818_s24  ;;  %p1822_p1 = scmp.lt.u32.totalorder %s1818_s24, %s2181_s1 }
   0x7   :  { %p1824_p2 = pnand %p1822_p1, %p1819_p0 }
   0x9   :  { %1827 = shalt.err (!%p1824_p2)
}
   0xa   :  { %s1828_s29 = scalar_lea.vmem %s31_s19, 256  ;;  %p1833_p4 = scmp.lt.s32.totalorder %s31_s19, %s31_s19 }
   0xb   :  { %p1829_p3 = scmp.ne.s32.totalorder %s31_s19, %s1828_s29  ;;  %p1834_p5 = scmp.lt.s32.totalorder %s1828_s29, %s1828_s29 }
   0xd   :  { %p1835_p6 = por %p1834_p5, %p1833_p4 }
   0xf   :  { %p1836_p7 = pnand %p1835_p6, %p1829_p3 }
  0x11   :  { %1839 = shalt.err (!%p1836_p7)
}
  0x12   :  { %s1914_s30 = smov 64   ;;  %s1915_s6 = smov 4  }
  0x13   :  { %36 = dma.hbm_to_vmem [thread:$0]  %s2181_s1, 256, %s31_s19, [#allocation6], %s1914_s30, %s1914_s30, %s1915_s6  }
  0x14   :  { %s1840_s11 = scalar_lea.hbm %s2180_s0, 128 }
  0x15   :  { %p1841_p8 = scmp.ne.s32.totalorder %s2180_s0, %s1840_s11  ;;  %p1844_p9 = scmp.lt.u32.totalorder %s1840_s11, %s2180_s0 }
  0x17   :  { %p1846_p10 = pnand %p1844_p9, %p1841_p8 }
  0x19   :  { %1849 = shalt.err (!%p1846_p10)
}
  0x1a   :  { %s1850_s16 = scalar_lea.vmem %s1964_s21, 128  ;;  %p1855_p12 = scmp.lt.s32.totalorder %s1964_s21, %s1964_s21 }
  0x1b   :  { %p1851_p11 = scmp.ne.s32.totalorder %s1964_s21, %s1850_s16  ;;  %p1856_p13 = scmp.lt.s32.totalorder %s1850_s16, %s1850_s16 }
  0x1d   :  { %p1857_p0 = por %p1856_p13, %p1855_p12 }
  0x1f   :  { %p1858_p1 = pnand %p1857_p0, %p1851_p11 }
  0x21   :  { %1861 = shalt.err (!%p1858_p1)
}
  0x22   :  { %24 = dma.hbm_to_vmem [thread:$0]  %s2180_s0, 128, %s1964_s21, [#allocation3], %s1914_s30, %s1914_s30, %s1915_s6  }
  0x23   :  { %s1916_s18 = smov [#allocation7]   ;;  %s1862_s23 = scalar_lea.hbm %s2183_s3, 256 }
  0x24   :  { %s44_s19 = sshll.u32 %s1916_s18, 4  ;;  %p1863_p2 = scmp.ne.s32.totalorder %s2183_s3, %s1862_s23  ;;  %s45_s19 = int_to_ptr.vmem [resolvable:$true] %s44_s19 }
  0x25   :  { %p1866_p3 = scmp.lt.u32.totalorder %s1862_s23, %s2183_s3 }
  0x27   :  { %p1868_p4 = pnand %p1866_p3, %p1863_p2 }
  0x29   :  { %1871 = shalt.err (!%p1868_p4)
}
  0x2a   :  { %s1872_s28 = scalar_lea.vmem %s45_s19, 256  ;;  %p1877_p6 = scmp.lt.s32.totalorder %s45_s19, %s45_s19 }
  0x2b   :  { %p1873_p5 = scmp.ne.s32.totalorder %s45_s19, %s1872_s28  ;;  %p1878_p7 = scmp.lt.s32.totalorder %s1872_s28, %s1872_s28 }
  0x2d   :  { %p1879_p8 = por %p1878_p7, %p1877_p6 }
  0x2f   :  { %p1880_p9 = pnand %p1879_p8, %p1873_p5 }
  0x31   :  { %1883 = shalt.err (!%p1880_p9)
}
  0x32   :  { %50 = dma.hbm_to_vmem [thread:$0]  %s2183_s3, 256, %s45_s19, [#allocation6], %s1914_s30, %s1914_s30, %s1915_s6  }
  0x33   :  { %1906 = dma.done.wait [#allocation3], 128  }
  0x34   :  { %1907 = vsyncadd [#allocation3], 4294967168 }
  0x35   :  { %1908 = dma.done.wait [#allocation6], 512  }
  0x36   :  { %1909 = vsyncadd [#allocation6], 4294966784  ;;  %v1917_v0 = vmov 0.0   ;;  %vm1918_vm0 = vmmov 0   ;;  %v1781_v1 = vld [vmem:[#allocation5] sm:$0xff]   ;;  %v1782_v2 = vld [vmem:[#allocation5 + $0x8] sm:$0xff]  }
  0x37   :  { %1648 = vmatprep.subr.bf16.mxu0 %v1917_v0  ;;  %1652 = vmatprep.mubr.msk.bf16.mxu0 %vm1918_vm0, %v1917_v0  ;;  %v1783_v3 = vld [vmem:[#allocation2] sm:$0xff]   ;;  %vm93_vm1 = vcmask 261120   ;;  %s1919_s6 = smov 88   ;;  %s1920_s7 = smov 96   ;;  %vm192_vm2 = vcmask 64512   ;;  %vm1483_vm3 = vcmask 130048  }
  0x38   :  { %1661 = vmatprep.subr.mxu1 %v1917_v0  ;;  %1663 = vmatprep.mubr.msk.f32.mxu1 %vm1918_vm0, %v1917_v0  ;;  %v1577_v4 = vld [vmem:[%s2182_s2] ss:$0 sm:$0xff]  ;;  %s1921_s8 = smov 120   ;;  %s1922_s2 = smov 80   ;;  %vm1486_vm4 = vcmask 195584  }
  0x39   :  { %1649 = vmatpush3.bf16.msra.mxu0 %v1781_v1  ;;  %s1923_s9 = smov 112   ;;  %s1924_s10 = smov 72  }
  0x3a   :  { %1650 = vmatprep.subr.bf16.mxu0 %v1917_v0  ;;  %s1925_s11 = smov 104   ;;  %s1926_s12 = smov 56  }
  0x3b   :  { %s1927_s13 = smov 48   ;;  %s1929_s14 = smov 8  }
  0x3c   :  { %s1930_s15 = smov 16   ;;  %s1931_s16 = smov 24  }
  0x3d   :  { %1651 = vmatpush3.bf16.msra.mxu0 %v1782_v2  ;;  %s1932_s18 = smov [#allocation8]  }
  0x3e   :  { %1656 = vmatprep.subr.mxu0 %v1917_v0  ;;  %s1564_s19 = sshll.u32 %s1932_s18, 4  ;;  %s1565_s19 = int_to_ptr.vmem [resolvable:$true] %s1564_s19 }
  0x3f   :  { %s1884_s20 = scalar_lea.vmem %s1565_s19, 256  ;;  %p1889_p11 = scmp.lt.s32.totalorder %s1565_s19, %s1565_s19 }
  0x40   :  { %1653 = vmatmul.mubr.msk.bf16.vlgmr.msra.gmra.mrb[0].mxu0 %vm93_vm1, %v1783_v3  ;;  %p1885_p10 = scmp.ne.s32.totalorder %s1565_s19, %s1884_s20  ;;  %p1890_p12 = scmp.lt.s32.totalorder %s1884_s20, %s1884_s20 }
  0x41   :  { %1658 = vmatprep.mubr.msk.f32.mxu0 %vm1918_vm0, %v1917_v0 }
  0x42   :  { %p1891_p13 = por %p1890_p12, %p1889_p11 }
  0x44   :  { %p1892_p0 = pnand %p1891_p13, %p1885_p10 }
 0x113   :  { %v131_v5 = vpop.f32.mrb[0].mxu0 }
 0x114   :  { %v2030_v6 = vadd.f32 %v1577_v4, %v131_v5  ;;  %v1654_v7 = vpop.f32.mrb[1].mxu0 }
 0x115   :  { %v134_v8 = vpop.f32.mrb[2].mxu0 }
 0x116   :  { %156 = vrot.lane.b32.xlu1 %v2030_v6, %s1919_s6  ;;  %152 = vrot.lane.b32.xlu0 %v2030_v6, %s1920_s7  ;;  %v1655_v9 = vpop.f32.mrb[3].mxu0  ;;  %v2034_v10 = vadd.f32 %v1577_v4, %v134_v8 }
 0x11a   :  { %140 = vrot.lane.b32.xlu0 %v2030_v6, %s1921_s8  ;;  %158 = vrot.lane.b32.xlu1 %v2034_v10, %s1919_s6 }
 0x11e   :  { %142 = vrot.lane.b32.xlu1 %v2034_v10, %s1921_s8  ;;  %154 = vrot.lane.b32.xlu0 %v2034_v10, %s1920_s7 }
 0x122   :  { %162 = vrot.lane.b32.xlu1 %v2034_v10, %s1922_s2  ;;  %160 = vrot.lane.b32.xlu0 %v2030_v6, %s1922_s2 }
 0x126   :  { %146 = vrot.lane.b32.xlu1 %v2034_v10, %s1923_s9  ;;  %144 = vrot.lane.b32.xlu0 %v2030_v6, %s1923_s9 }
 0x12a   :  { %166 = vrot.lane.b32.xlu1 %v2034_v10, %s1924_s10  ;;  %164 = vrot.lane.b32.xlu0 %v2030_v6, %s1924_s10 }
 0x12e   :  { %150 = vrot.lane.b32.xlu1 %v2034_v10, %s1925_s11  ;;  %148 = vrot.lane.b32.xlu0 %v2030_v6, %s1925_s11 }
 0x188   :  { %v157_v11 = vpop.permute.xlu1 %156  ;;  %v153_v12 = vpop.permute.xlu0 %152 }
 0x189   :  { %1657 = vmatpush3.xpose.msk.msra.mxu0 %vm192_vm2, %v153_v12 }
 0x18a   :  { %1671 = vmatprep.subr.mxu0 %v1917_v0 }
 0x18c   :  { %1659 = vmatmul.mubr.msk.f32.vlgmr.msra.gmra.mrb[4].mxu0 %vm192_vm2, %v2030_v6  ;;  %v141_v13 = vpop.permute.xlu0 %140  ;;  %v159_v14 = vpop.permute.xlu1 %158 }
 0x18d   :  { %1672 = vmatpush3.xpose.msk.msra.mxu0 %vm192_vm2, %v159_v14  ;;  %1673 = vmatprep.mubr.msk.f32.mxu0 %vm1918_vm0, %v1917_v0 }
 0x18e   :  { %1681 = vmatprep.subr.mxu0 %v1917_v0 }
 0x190   :  { %v143_v15 = vpop.permute.xlu1 %142  ;;  %v155_v16 = vpop.permute.xlu0 %154 }
 0x191   :  { %1662 = vmatpush3.xpose.msk.msra.mxu1 %vm192_vm2, %v155_v16  ;;  %1674 = vmatmul.mubr.msk.f32.vlgmr.msra.gmra.mrb[6].mxu0 %vm192_vm2, %v143_v15 }
 0x192   :  { %1666 = vmatprep.subr.mxu1 %v1917_v0  ;;  %1683 = vmatprep.mubr.msk.f32.mxu0 %vm1918_vm0, %v1917_v0 }
 0x194   :  { %v163_v17 = vpop.permute.xlu1 %162  ;;  %1664 = vmatmul.mubr.msk.f32.vlgmr.msra.gmra.mrb[0].mxu1 %vm192_vm2, %v2034_v10  ;;  %v161_v18 = vpop.permute.xlu0 %160 }
 0x195   :  { %1667 = vmatpush3.xpose.msk.msra.mxu1 %vm192_vm2, %v157_v11  ;;  %1682 = vmatpush3.xpose.msk.msra.mxu0 %vm192_vm2, %v163_v17 }
 0x196   :  { %1668 = vmatprep.mubr.msk.f32.mxu1 %vm1918_vm0, %v1917_v0  ;;  %1676 = vmatprep.subr.mxu1 %v1917_v0 }
 0x197   :  { %1691 = vmatprep.subr.mxu0 %v1917_v0 }
 0x198   :  { %v147_v19 = vpop.permute.xlu1 %146  ;;  %1669 = vmatmul.mubr.msk.f32.vlgmr.msra.gmra.mrb[2].mxu1 %vm192_vm2, %v141_v13  ;;  %v145_v20 = vpop.permute.xlu0 %144 }
 0x199   :  { %1677 = vmatpush3.xpose.msk.msra.mxu1 %vm192_vm2, %v161_v18  ;;  %1684 = vmatmul.mubr.msk.f32.vlgmr.msra.gmra.mrb[8].mxu0 %vm192_vm2, %v147_v19 }
 0x19a   :  { %1678 = vmatprep.mubr.msk.f32.mxu1 %vm1918_vm0, %v1917_v0  ;;  %1686 = vmatprep.subr.mxu1 %v1917_v0 }
 0x19b   :  { %1693 = vmatprep.mubr.msk.f32.mxu0 %vm1918_vm0, %v1917_v0 }
 0x19c   :  { %v167_v21 = vpop.permute.xlu1 %166  ;;  %1679 = vmatmul.mubr.msk.f32.vlgmr.msra.gmra.mrb[4].mxu1 %vm192_vm2, %v145_v20  ;;  %v165_v22 = vpop.permute.xlu0 %164 }
 0x19d   :  { %1687 = vmatpush3.xpose.msk.msra.mxu1 %vm192_vm2, %v165_v22  ;;  %1692 = vmatpush3.xpose.msk.msra.mxu0 %vm192_vm2, %v167_v21 }
 0x19e   :  { %1688 = vmatprep.mubr.msk.f32.mxu1 %vm1918_vm0, %v1917_v0  ;;  %1696 = vmatprep.subr.mxu1 %v1917_v0 }
 0x19f   :  { %1701 = vmatprep.subr.mxu0 %v1917_v0 }
 0x1a0   :  { %v151_v23 = vpop.permute.xlu1 %150  ;;  %v149_v24 = vpop.permute.xlu0 %148 }
 0x1a1   :  { %1689 = vmatmul.mubr.msk.f32.vlgmr.msra.gmra.mrb[6].mxu1 %vm192_vm2, %v149_v24  ;;  %1694 = vmatmul.mubr.msk.f32.vlgmr.msra.gmra.mrb[10].mxu0 %vm192_vm2, %v151_v23 }
 0x1a2   :  { %1698 = vmatprep.mubr.msk.f32.mxu1 %vm1918_vm0, %v1917_v0  ;;  %1703 = vmatprep.mubr.msk.f32.mxu0 %vm1918_vm0, %v1917_v0 }
 0x25f   :  { %v263_v25 = vpop.f32.mrb[4].mxu0 }
 0x260   :  { %v1660_v26 = vpop.f32.mrb[5].mxu0  ;;  %v785_v27 = vsel %vm192_vm2, %v263_v25, -inf }
 0x261   :  { %786 = vmax.xlane.f32.xlu0 %v785_v27 }
 0x264   :  { %v485_v28 = vpop.f32.mrb[6].mxu0 }
 0x265   :  { %v1675_v29 = vpop.f32.mrb[7].mxu0  ;;  %v794_v30 = vsel %vm192_vm2, %v485_v28, -inf }
 0x266   :  { %795 = vmax.xlane.f32.xlu0 %v794_v30 }
 0x267   :  { %v337_v31 = vpop.f32.mrb[0].mxu1 }
 0x268   :  { %v1665_v32 = vpop.f32.mrb[1].mxu1  ;;  %v788_v33 = vsel %vm192_vm2, %v337_v31, -inf }
 0x269   :  { %789 = vmax.xlane.f32.xlu1 %v788_v33 }
 0x26b   :  { %v411_v34 = vpop.f32.mrb[2].mxu1 }
 0x26c   :  { %v1670_v35 = vpop.f32.mrb[3].mxu1  ;;  %v633_v36 = vpop.f32.mrb[8].mxu0  ;;  %v791_v37 = vsel %vm192_vm2, %v411_v34, -inf }
 0x26d   :  { %792 = vmax.xlane.f32.xlu0 %v791_v37  ;;  %v1685_v38 = vpop.f32.mrb[9].mxu0  ;;  %v800_v42 = vsel %vm192_vm2, %v633_v36, -inf }
 0x26f   :  { %v559_v39 = vpop.f32.mrb[4].mxu1 }
 0x270   :  { %v1680_v40 = vpop.f32.mrb[5].mxu1  ;;  %v797_v41 = vsel %vm192_vm2, %v559_v39, -inf }
 0x271   :  { %798 = vmax.xlane.f32.xlu1 %v797_v41  ;;  %801 = vmax.xlane.f32.xlu0 %v800_v42 }
 0x274   :  { %v707_v43 = vpop.f32.mrb[6].mxu1  ;;  %v781_v44 = vpop.f32.mrb[10].mxu0 }
 0x275   :  { %v1690_v45 = vpop.f32.mrb[7].mxu1  ;;  %v1695_v46 = vpop.f32.mrb[11].mxu0  ;;  %v803_v47 = vsel %vm192_vm2, %v707_v43, -inf  ;;  %v806_v48 = vsel %vm192_vm2, %v781_v44, -inf }
 0x276   :  { %804 = vmax.xlane.f32.xlu1 %v803_v47  ;;  %807 = vmax.xlane.f32.xlu0 %v806_v48 }
 0x287   :  { %168 = vrot.lane.b32.xlu1 %v2030_v6, %s1914_s30 }
 0x28b   :  { %174 = vrot.lane.b32.xlu1 %v2030_v6, %s1926_s12 }
 0x28c   :  { %170 = vrot.lane.b32.xlu0 %v2034_v10, %s1914_s30  ;;  %s1928_s30 = smov 40  }
 0x28f   :  { %176 = vrot.lane.b32.xlu1 %v2034_v10, %s1926_s12 }
 0x290   :  { %180 = vrot.lane.b32.xlu0 %v2030_v6, %s1927_s13 }
 0x293   :  { %182 = vrot.lane.b32.xlu1 %v2034_v10, %s1927_s13 }
 0x2ee   :  { %v787_v49 = vpop.xlane.xlu0 %786 }
 0x2ef   :  { %v809_v50 = vsub.f32 %v263_v25, %v787_v49 }
 0x2f1   :  { %v817_v51 = vmul.f32 1.442695, %v809_v50 }
 0x2f3   :  { %1786 = vpow2.f32 %v817_v51  ;;  %v796_v52 = vpop.xlane.xlu0 %795 }
 0x2f4   :  { %v812_v53 = vsub.f32 %v485_v28, %v796_v52 }
 0x2f6   :  { %v790_v54 = vpop.xlane.xlu1 %789  ;;  %v823_v56 = vmul.f32 1.442695, %v812_v53 }
 0x2f7   :  { %v810_v55 = vsub.f32 %v337_v31, %v790_v54 }
 0x2f9   :  { %v819_v57 = vmul.f32 1.442695, %v810_v55 }
 0x2fa   :  { %v793_v58 = vpop.xlane.xlu0 %792 }
 0x2fb   :  { %1788 = vpow2.f32 %v819_v57  ;;  %v811_v59 = vsub.f32 %v411_v34, %v793_v58 }
 0x2fc   :  { %1790 = vpow2.f32 %v823_v56 }
 0x2fd   :  { %v1787_v60 = vpop.eup %1786  ;;  %v821_v61 = vmul.f32 1.442695, %v811_v59 }
 0x2fe   :  { %v799_v62 = vpop.xlane.xlu1 %798  ;;  %v802_v63 = vpop.xlane.xlu0 %801  ;;  %v833_v1 = vsel %vm192_vm2, %v1787_v60, 0.0 }
 0x2ff   :  { %1792 = vpow2.f32 %v821_v61  ;;  %v813_v2 = vsub.f32 %v559_v39, %v799_v62  ;;  %v814_v3 = vsub.f32 %v633_v36, %v802_v63  ;;  %834 = vadd.xlane.f32.xlu1 %v833_v1  ;;  %v1784_v62 = vld [vmem:[#allocation7] sm:$0xff]  }
 0x301   :  { %v825_v4 = vmul.f32 1.442695, %v813_v2  ;;  %v827_v5 = vmul.f32 1.442695, %v814_v3  ;;  %v1785_v3 = vld [vmem:[#allocation7 + $0x8] sm:$0xff]  }
 0x303   :  { %1794 = vpow2.f32 %v825_v4  ;;  %v805_v7 = vpop.xlane.xlu1 %804  ;;  %v808_v8 = vpop.xlane.xlu0 %807 }
 0x304   :  { %1796 = vpow2.f32 %v827_v5  ;;  %v815_v9 = vsub.f32 %v707_v43, %v805_v7  ;;  %v816_v11 = vsub.f32 %v781_v44, %v808_v8 }
 0x305   :  { %v1789_v12 = vpop.eup %1788 }
 0x306   :  { %v829_v13 = vmul.f32 1.442695, %v815_v9  ;;  %v831_v14 = vmul.f32 1.442695, %v816_v11  ;;  %v836_v15 = vsel %vm192_vm2, %v1789_v12, 0.0  ;;  %v2108_v16 = vpop.eup %1790 }
 0x307   :  { %v169_v17 = vpop.permute.xlu1 %168  ;;  %837 = vadd.xlane.f32.xlu0 %v836_v15  ;;  %v171_v18 = vpop.permute.xlu0 %170  ;;  %v842_v21 = vsel %vm192_vm2, %v2108_v16, 0.0 }
 0x308   :  { %1798 = vpow2.f32 %v829_v13  ;;  %1697 = vmatpush3.msra.mxu1 %v169_v17  ;;  %1702 = vmatpush3.msra.mxu0 %v171_v18 }
 0x309   :  { %v1793_v19 = vpop.eup %1792  ;;  %1800 = vpow2.f32 %v831_v14  ;;  %1706 = vmatprep.subr.mxu1 %v1917_v0  ;;  %1711 = vmatprep.subr.mxu0 %v1917_v0 }
 0x30a   :  { %v839_v20 = vsel %vm192_vm2, %v1793_v19, 0.0 }
 0x30b   :  { %840 = vadd.xlane.f32.xlu1 %v839_v20  ;;  %843 = vadd.xlane.f32.xlu0 %v842_v21  ;;  %v175_v30 = vpop.permute.xlu1 %174  ;;  %v181_v34 = vpop.permute.xlu0 %180 }
 0x30d   :  { %v1795_v22 = vpop.eup %1794 }
 0x30e   :  { %v1797_v23 = vpop.eup %1796  ;;  %v845_v24 = vsel %vm192_vm2, %v1795_v22, 0.0 }
 0x30f   :  { %846 = vadd.xlane.f32.xlu1 %v845_v24  ;;  %v848_v25 = vsel %vm192_vm2, %v1797_v23, 0.0  ;;  %v177_v31 = vpop.permute.xlu1 %176 }
 0x310   :  { %849 = vadd.xlane.f32.xlu0 %v848_v25 }
 0x312   :  { %v2117_v26 = vpop.eup %1798 }
 0x313   :  { %v2119_v27 = vpop.eup %1800  ;;  %v851_v28 = vsel %vm192_vm2, %v2117_v26, 0.0  ;;  %v183_v32 = vpop.permute.xlu1 %182 }
 0x314   :  { %852 = vadd.xlane.f32.xlu1 %v851_v28  ;;  %v854_v29 = vsel %vm192_vm2, %v2119_v27, 0.0 }
 0x315   :  { %855 = vadd.xlane.f32.xlu0 %v854_v29 }
 0x325   :  { %188 = vrot.lane.b32.xlu1 %v2034_v10, %s1928_s30 }
 0x32b   :  { %186 = vrot.lane.b32.xlu0 %v2030_v6, %s1928_s30 }
 0x38c   :  { %v835_v33 = vpop.xlane.xlu1 %834 }
 0x38d   :  { %1802 = vrcp.f32 %v835_v33  ;;  %v1606_v33 = vld [vmem:[%s2184_s4] ss:$0 sm:$0xff] }
 0x394   :  { %v838_v35 = vpop.xlane.xlu0 %837 }
 0x395   :  { %1804 = vrcp.f32 %v838_v35 }
 0x397   :  { %v1803_v36 = vpop.eup %1802 }
 0x398   :  { %v865_v37 = vmul.f32 %v1803_v36, %v1787_v60  ;;  %v841_v38 = vpop.xlane.xlu1 %840  ;;  %v844_v39 = vpop.xlane.xlu0 %843 }
 0x399   :  { %1806 = vrcp.f32 %v841_v38 }
 0x39a   :  { %1808 = vrcp.f32 %v844_v39  ;;  %1699 = vmatmul.mubr.msk.f32.vlgmr.msra.gmra.mrb[8].mxu1 %vm192_vm2, %v865_v37 }
 0x39b   :  { %1707 = vmatpush3.msra.mxu1 %v175_v30  ;;  %1708 = vmatprep.mubr.msk.f32.mxu1 %vm1918_vm0, %v1917_v0 }
 0x39c   :  { %v847_v6 = vpop.xlane.xlu1 %846  ;;  %1716 = vmatprep.subr.mxu1 %v1917_v0 }
 0x39d   :  { %1810 = vrcp.f32 %v847_v6  ;;  %v850_v10 = vpop.xlane.xlu0 %849 }
 0x39e   :  { %1812 = vrcp.f32 %v850_v10 }
 0x39f   :  { %v1805_v40 = vpop.eup %1804 }
 0x3a0   :  { %v866_v41 = vmul.f32 %v1805_v40, %v1789_v12 }
 0x3a1   :  { %v853_v42 = vpop.xlane.xlu1 %852 }
 0x3a2   :  { %1814 = vrcp.f32 %v853_v42  ;;  %v856_v43 = vpop.xlane.xlu0 %855  ;;  %1704 = vmatmul.mubr.msk.f32.vlgmr.msra.gmra.mrb[12].mxu0 %vm192_vm2, %v866_v41 }
 0x3a3   :  { %v1807_v44 = vpop.eup %1806  ;;  %1816 = vrcp.f32 %v856_v43  ;;  %1712 = vmatpush3.msra.mxu0 %v177_v31  ;;  %1713 = vmatprep.mubr.msk.f32.mxu0 %vm1918_vm0, %v1917_v0 }
 0x3a4   :  { %v1809_v45 = vpop.eup %1808  ;;  %v867_v46 = vmul.f32 %v1807_v44, %v1793_v19  ;;  %1721 = vmatprep.subr.mxu0 %v1917_v0 }
 0x3a5   :  { %v868_v47 = vmul.f32 %v1809_v45, %v2108_v16  ;;  %v189_v53 = vpop.permute.xlu1 %188 }
 0x3a6   :  { %1709 = vmatmul.mubr.msk.f32.vlgmr.msra.gmra.mrb[10].mxu1 %vm192_vm2, %v867_v46  ;;  %v187_v52 = vpop.permute.xlu0 %186 }
 0x3a7   :  { %v1811_v48 = vpop.eup %1810  ;;  %1714 = vmatmul.mubr.msk.f32.vlgmr.msra.gmra.mrb[14].mxu0 %vm192_vm2, %v868_v47  ;;  %1717 = vmatpush3.msra.mxu1 %v181_v34 }
 0x3a8   :  { %v1813_v49 = vpop.eup %1812  ;;  %v869_v50 = vmul.f32 %v1811_v48, %v1795_v22  ;;  %1722 = vmatpush3.msra.mxu0 %v183_v32  ;;  %1718 = vmatprep.mubr.msk.f32.mxu1 %vm1918_vm0, %v1917_v0 }
 0x3a9   :  { %v870_v51 = vmul.f32 %v1813_v49, %v1797_v23  ;;  %1723 = vmatprep.mubr.msk.f32.mxu0 %vm1918_vm0, %v1917_v0  ;;  %1726 = vmatprep.subr.mxu1 %v1917_v0 }
 0x3aa   :  { %1731 = vmatprep.subr.mxu0 %v1917_v0  ;;  %1719 = vmatmul.mubr.msk.f32.vlgmr.msra.gmra.mrb[12].mxu1 %vm192_vm2, %v869_v50 }
 0x3ab   :  { %1724 = vmatmul.mubr.msk.f32.vlgmr.msra.gmra.mrb[16].mxu0 %vm192_vm2, %v870_v51  ;;  %1727 = vmatpush3.msra.mxu1 %v187_v52 }
 0x3ac   :  { %v1815_v54 = vpop.eup %1814  ;;  %1732 = vmatpush3.msra.mxu0 %v189_v53  ;;  %1728 = vmatprep.mubr.msk.f32.mxu1 %vm1918_vm0, %v1917_v0 }
 0x3ad   :  { %v1817_v55 = vpop.eup %1816  ;;  %v871_v56 = vmul.f32 %v1815_v54, %v2117_v26  ;;  %1733 = vmatprep.mubr.msk.f32.mxu0 %vm1918_vm0, %v1917_v0  ;;  %1736 = vmatprep.subr.bf16.mxu1 %v1917_v0 }
 0x3ae   :  { %v872_v57 = vmul.f32 %v1817_v55, %v2119_v27 }
 0x3af   :  { %1729 = vmatmul.mubr.msk.f32.vlgmr.msra.gmra.mrb[14].mxu1 %vm192_vm2, %v871_v56 }
 0x3b0   :  { %1734 = vmatmul.mubr.msk.f32.vlgmr.msra.gmra.mrb[18].mxu0 %vm192_vm2, %v872_v57  ;;  %1740 = vmatprep.mubr.msk.bf16.mxu1 %vm1918_vm0, %v1917_v0 }
 0x3b1   :  { %1737 = vmatpush3.bf16.msra.mxu1 %v1784_v62 }
 0x3b2   :  { %1738 = vmatprep.subr.bf16.mxu1 %v1917_v0 }
 0x3b5   :  { %1739 = vmatpush3.bf16.msra.mxu1 %v1785_v3 }
 0x46d   :  { %v942_v58 = vpop.f32.mrb[8].mxu1 }
 0x46e   :  { %v1700_v59 = vpop.f32.mrb[9].mxu1 }
 0x475   :  { %v1015_v60 = vpop.f32.mrb[12].mxu0 }
 0x476   :  { %v1705_v61 = vpop.f32.mrb[13].mxu0 }
 0x479   :  { %v1088_v63 = vpop.f32.mrb[10].mxu1 }
 0x47a   :  { %v1161_v1 = vpop.f32.mrb[14].mxu0  ;;  %v1710_v2 = vpop.f32.mrb[11].mxu1 }
 0x47b   :  { %v1766_v4 = vpack.i.bf16 %v1161_v1, %v1088_v63  ;;  %v1715_v5 = vpop.f32.mrb[15].mxu0 }
 0x47d   :  { %1767 = vrot.lane.b32.xlu0 %v1766_v4, %s1929_s14  ;;  %v1234_v7 = vpop.f32.mrb[12].mxu1 }
 0x47e   :  { %v1307_v8 = vpop.f32.mrb[16].mxu0  ;;  %v1720_v9 = vpop.f32.mrb[13].mxu1 }
 0x47f   :  { %v1771_v11 = vpack.i.bf16 %v1307_v8, %v1234_v7  ;;  %v1725_v12 = vpop.f32.mrb[17].mxu0 }
 0x481   :  { %1772 = vrot.lane.b32.xlu1 %v1771_v11, %s1930_s15 }
 0x482   :  { %v1380_v13 = vpop.f32.mrb[14].mxu1 }
 0x483   :  { %v1453_v14 = vpop.f32.mrb[18].mxu0  ;;  %v1730_v15 = vpop.f32.mrb[15].mxu1 }
 0x484   :  { %v1776_v0 = vpack.i.bf16 %v1453_v14, %v1380_v13  ;;  %v1735_v16 = vpop.f32.mrb[19].mxu0 }
 0x486   :  { %1777 = vrot.lane.b32.xlu0 %v1776_v0, %s1931_s16 }
 0x4ef   :  { %v1768_v17 = vpop.permute.xlu0 %1767 }
 0x4f0   :  { %v1770_v19 = vunpack.i.h.bf16 %v1768_v17  ;;  %v1769_v20 = vunpack.i.l.bf16 %v1768_v17 }
 0x4f2   :  { %v1482_v24 = vsel %vm192_vm2, %v1015_v60, %v1770_v19  ;;  %v1481_v25 = vsel %vm192_vm2, %v942_v58, %v1769_v20 }
 0x4f3   :  { %v1773_v18 = vpop.permute.xlu1 %1772 }
 0x4f4   :  { %v1775_v21 = vunpack.i.h.bf16 %v1773_v18  ;;  %v1774_v22 = vunpack.i.l.bf16 %v1773_v18 }
 0x4f6   :  { %v1485_v28 = vsel %vm1483_vm3, %v1482_v24, %v1775_v21  ;;  %v1484_v29 = vsel %vm1483_vm3, %v1481_v25, %v1774_v22 }
 0x4f8   :  { %v1778_v23 = vpop.permute.xlu0 %1777 }
 0x4f9   :  { %v1780_v26 = vunpack.i.h.bf16 %v1778_v23  ;;  %v1779_v27 = vunpack.i.l.bf16 %v1778_v23 }
 0x4fb   :  { %v1488_v30 = vsel %vm1486_vm4, %v1485_v28, %v1780_v26  ;;  %v1487_v31 = vsel %vm1486_vm4, %v1484_v29, %v1779_v27 }
 0x4fc   :  { %v1489_v32 = vpack.c.bf16 %v1488_v30, %v1487_v31 }
 0x4fe   :  { %1741 = vmatmul.mubr.msk.bf16.vlgmr.msra.gmra.mrb[16].mxu1 %vm93_vm1, %v1489_v32 }
 0x5d1   :  { %v1550_v34 = vpop.f32.mrb[16].mxu1 }
 0x5d2   :  { %v1551_v35 = vadd.f32 %v1606_v33, %v1550_v34  ;;  %v1742_v36 = vpop.f32.mrb[17].mxu1 }
 0x5d3   :  { %v1553_v37 = vpop.f32.mrb[18].mxu1 }
 0x5d4   :  { %1557 = vst.msk [vmem:[#allocation8] sm:$0xff] %vm93_vm1, %v1551_v35  ;;  %v1554_v38 = vadd.f32 %v1606_v33, %v1553_v37  ;;  %v1743_v39 = vpop.f32.mrb[19].mxu1 }
 0x5d6   :  { %1558 = vst.msk [vmem:[#allocation8 + $0x8] sm:$0xff] %vm93_vm1, %v1554_v38 }
 0x5d7   :  { %1895 = shalt.err (!%p1892_p0)
}
 0x5d8   :  { %s1896_s23 = scalar_lea.hbm %s2185_s5, 256 }
 0x5d9   :  { %p1897_p1 = scmp.ne.s32.totalorder %s2185_s5, %s1896_s23  ;;  %p1900_p2 = scmp.lt.u32.totalorder %s1896_s23, %s2185_s5 }
 0x5db   :  { %p1902_p3 = pnand %p1900_p2, %p1897_p1 }
 0x5dd   :  { %1905 = shalt.err (!%p1902_p3)
}
 0x5de   :  { %s1933_s28 = smov 128  }
 0x5df   :  { %1570 = dma.vmem_to_hbm [thread:$0]  %s1565_s19, 256, %s2185_s5, [#allocation4], %s1933_s28, %s1933_s28, %s1929_s14  }
 0x5e0   :  { %1910 = dma.done.wait [#allocation4], 256  }
 0x5e1   :  { %1911 = vsyncadd [#allocation4], 4294967040 }
 0x5e2   :  { %1574 = vsyncpa [#allocation3], 1 }
 0x5e3   :  { %1575 = vsyncpa [#allocation6], 1 }
 0x5e4   :  { %1576 = vsyncpa [#allocation4], 1 }

</bundles_post_ra>
